<compile_context>
chip_gen: v7x
topology: tpu7x:2x2x1
jax: 0.10.0
libtpu: 0.0.40
codegen_flags: <defaults>
</compile_context>

<pallas_src>
import functools

import jax
import jax.numpy as jnp
from jax import lax
from jax.experimental import pallas as pl
from jax.experimental.pallas import tpu as pltpu

MARGIN = 1.0


def _hinge_loss_kernel(x_ref, t_ref, o_ref, acc_ref, *,
                       n_rows, tile_rows, blocks_per_core, inv_count, needs_mask):
    c = pl.program_id(0)   # core-split ("parallel") axis
    i = pl.program_id(1)   # row-block ("arbitrary" / reduction) axis

    @pl.when(i == 0)
    def _init():
        acc_ref[...] = jnp.zeros_like(acc_ref)

    x = x_ref[...].astype(jnp.float32)
    t = t_ref[...].astype(jnp.float32)
    hinge = jnp.maximum(MARGIN - x * t, 0.0)

    if needs_mask:
        # Rows past the true row count (partial last tile, or a clamped phantom
        # block on the second core) contribute exactly 0.  Trace-time skipped
        # when the tiling is exact.
        block_idx = c * blocks_per_core + i
        row0 = block_idx * tile_rows
        row_ids = row0 + lax.broadcasted_iota(jnp.int32, hinge.shape, 0)
        hinge = jnp.where(row_ids < n_rows, hinge, 0.0)

    # Tree-reduce the tile over sublane groups (pure VPU adds, no XLU, no
    # per-vreg acc read-modify-write) into the small (8, cols) accumulator.
    cols = hinge.shape[1]
    acc_ref[...] += jnp.sum(hinge.reshape(tile_rows // 8, 8, cols), axis=0)

    @pl.when(i == pl.num_programs(1) - 1)
    def _finalize():
        # Single cross-lane reduction + scale by precomputed 1/(N*C) per core.
        partial = jnp.sum(acc_ref[...]) * inv_count
        o_ref[...] = jnp.broadcast_to(partial, o_ref.shape)


def _default_tile_bytes() -> int:
    """Per-input tile budget: 2 MiB on v5 parts (16 MiB scoped VMEM), else 4 MiB."""
    try:
        kind = jax.devices()[0].device_kind.lower()
    except Exception:  # pragma: no cover - defensive
        kind = ""
    if "v5" in kind:
        return 2 * 1024 * 1024
    return 4 * 1024 * 1024


def _pick_tile_rows(rows: int, cols: int, itemsize: int, target_tile_bytes: int) -> int:
    bytes_per_row = cols * itemsize
    tile_rows = max(8, (target_tile_bytes // max(bytes_per_row, 1)) // 8 * 8)
    rows_rounded = pl.cdiv(rows, 8) * 8
    return int(min(tile_rows, rows_rounded))


def hinge_loss(x: jax.Array, t: jax.Array, *, target_tile_bytes: int | None = None) -> jax.Array:
    assert x.shape == t.shape, "input and target must have the same shape"
    total = int(x.size)
    assert total > 0

    # Collapse to 2-D (rows, cols): collapsing leading dims of a row-major array
    # is layout-preserving (no HBM relayout); the last dim stays the lane dim.
    cols = x.shape[-1] if x.ndim >= 2 else x.shape[0]
    rows = total // cols
    x2 = x.reshape(rows, cols)
    t2 = t.reshape(rows, cols)

    if target_tile_bytes is None:
        target_tile_bytes = _default_tile_bytes()

    itemsize = max(x2.dtype.itemsize, t2.dtype.itemsize)
    tile_rows = _pick_tile_rows(rows, cols, itemsize, target_tile_bytes)
    num_row_blocks = pl.cdiv(rows, tile_rows)
    num_cores = 2 if num_row_blocks >= 2 else 1          # v7x megacore split
    blocks_per_core = pl.cdiv(num_row_blocks, num_cores)
    has_phantom = num_cores * blocks_per_core != num_row_blocks
    needs_mask = (rows % tile_rows != 0) or has_phantom

    if has_phantom:
        # Keep DMA addresses in range for the phantom block; its (stale) data is
        # fully masked out in-kernel via the logical (unclamped) row indices.
        def in_map(c, i):
            return (jnp.minimum(c * blocks_per_core + i, num_row_blocks - 1), 0)
    else:
        def in_map(c, i):
            return (c * blocks_per_core + i, 0)

    kernel = functools.partial(
        _hinge_loss_kernel,
        n_rows=rows,
        tile_rows=tile_rows,
        blocks_per_core=blocks_per_core,
        inv_count=1.0 / float(total),
        needs_mask=needs_mask,
    )

    partials = pl.pallas_call(
        kernel,
        out_shape=jax.ShapeDtypeStruct((num_cores, 1, 128), jnp.float32),
        grid_spec=pltpu.PrefetchScalarGridSpec(
            num_scalar_prefetch=0,
            grid=(num_cores, blocks_per_core),
            in_specs=[
                pl.BlockSpec((tile_rows, cols), in_map),
                pl.BlockSpec((tile_rows, cols), in_map),
            ],
            out_specs=pl.BlockSpec((1, 1, 128), lambda c, i: (c, 0, 0)),
            scratch_shapes=[pltpu.VMEM((8, cols), jnp.float32)],
        ),
        compiler_params=pltpu.CompilerParams(
            dimension_semantics=("parallel", "arbitrary"),
        ),
        cost_estimate=pl.CostEstimate(
            flops=4 * total,
            transcendentals=0,
            bytes_accessed=total * (x2.dtype.itemsize + t2.dtype.itemsize)
            + num_cores * 128 * 4,
        ),
    )(x2, t2)

    # Each per-core partial is already scaled by 1/(N*C); summing them gives the mean.
    return jnp.sum(partials[:, 0, 0]).astype(x.dtype)


if __name__ == "__main__":
    key = jax.random.PRNGKey(0)
    kx, kt, kx2, kt2 = jax.random.split(key, 4)

    # Shapes consistent with the module: dense (batch, classes) logits with
    # {-1, +1} targets.
    N, C = 8, 128
    x = jax.random.normal(kx, (N, C), dtype=jnp.float32)
    t = jnp.where(jax.random.bernoulli(kt, 0.5, (N, C)), 1.0, -1.0).astype(jnp.float32)

    loss = hinge_loss(x, t)
    jax.block_until_ready(loss)
    ref = jnp.mean(jnp.maximum(MARGIN - x * t, 0.0))
    assert jnp.allclose(loss, ref, rtol=1e-5, atol=1e-6), (loss, ref)

    # Awkward (non-aligned) shape with a small tile budget to exercise the
    # multi-block grid, the 2-way core split (incl. a clamped phantom block)
    # and the in-kernel ragged-tail masking.
    N2, C2 = 257, 129
    x2 = jax.random.normal(kx2, (N2, C2), dtype=jnp.float32)
    t2 = jnp.where(jax.random.bernoulli(kt2, 0.5, (N2, C2)), 1.0, -1.0).astype(jnp.float32)
    loss2 = hinge_loss(x2, t2, target_tile_bytes=64 * 1024)
    jax.block_until_ready(loss2)
    ref2 = jnp.mean(jnp.maximum(MARGIN - x2 * t2, 0.0))
    assert jnp.allclose(loss2, ref2, rtol=1e-4, atol=1e-6), (loss2, ref2)

    print("KERNEL_OK")
</pallas_src>

<mosaic_0001>
module attributes {stable_mosaic.version = 11 : i64} {
  func.func @_hinge_loss_kernel(%arg0: i32, %arg1: i32, %arg2: memref<8x128xf32, #tpu.memory_space<vmem>>, %arg3: memref<8x128xf32, #tpu.memory_space<vmem>>, %arg4: memref<1x1x128xf32, #tpu.memory_space<vmem>>, %arg5: memref<8x128xf32, #tpu.memory_space<vmem>>) attributes {dimension_semantics = [#tpu.dimension_semantics<parallel>, #tpu.dimension_semantics<arbitrary>], iteration_bounds = array<i64: 1, 1>, scalar_prefetch = 0 : i64, scratch_operands = 1 : i64, tpu.core_type = #tpu.core_type<tc>, window_params = [{transform_indices = @transform_0, window_bounds = array<i64: 8, 128>}, {transform_indices = @transform_1, window_bounds = array<i64: 8, 128>}, {transform_indices = @transform_2, window_bounds = array<i64: 1, 1, 128>}]} {
    %c0_i32 = arith.constant 0 : i32
    %0 = arith.cmpi eq, %arg1, %c0_i32 : i32
    %1 = arith.extui %0 : i1 to i32
    %c0_i32_0 = arith.constant 0 : i32
    %2 = arith.cmpi ne, %1, %c0_i32_0 : i32
    scf.if %2 {
      %cst_12 = arith.constant 0.000000e+00 : f32
      %18 = vector.broadcast %cst_12 : f32 to vector<8x128xf32>
      %c0_13 = arith.constant 0 : index
      %c0_14 = arith.constant 0 : index
      %19 = vector.load %arg5[%c0_13, %c0_14] : memref<8x128xf32, #tpu.memory_space<vmem>>, vector<8x128xf32>
      tpu.vector_store %arg5[%c0_13, %c0_14], %18 {strides = array<i32>} : memref<8x128xf32, #tpu.memory_space<vmem>>, vector<8x128xf32>,
    } else {
    }
    %c0 = arith.constant 0 : index
    %c0_1 = arith.constant 0 : index
    %3 = vector.load %arg2[%c0, %c0_1] : memref<8x128xf32, #tpu.memory_space<vmem>>, vector<8x128xf32>
    %c0_2 = arith.constant 0 : index
    %c0_3 = arith.constant 0 : index
    %4 = vector.load %arg3[%c0_2, %c0_3] : memref<8x128xf32, #tpu.memory_space<vmem>>, vector<8x128xf32>
    %5 = arith.mulf %3, %4 : vector<8x128xf32>
    %cst = arith.constant 1.000000e+00 : f32
    %6 = vector.broadcast %cst : f32 to vector<8x128xf32>
    %7 = arith.subf %6, %5 : vector<8x128xf32>
    %cst_4 = arith.constant 0.000000e+00 : f32
    %8 = vector.broadcast %cst_4 : f32 to vector<8x128xf32>
    %9 = arith.maximumf %7, %8 : vector<8x128xf32>
    %c0_5 = arith.constant 0 : index
    %c0_6 = arith.constant 0 : index
    %10 = vector.load %arg5[%c0_5, %c0_6] : memref<8x128xf32, #tpu.memory_space<vmem>>, vector<8x128xf32>
    %11 = vector.shape_cast %9 : vector<8x128xf32> to vector<1x8x128xf32>
    %cst_7 = arith.constant dense<0.000000e+00> : vector<8x128xf32>
    %12 = vector.multi_reduction <add>, %11, %cst_7 [0] : vector<1x8x128xf32> to vector<8x128xf32>
    %13 = arith.addf %10, %12 : vector<8x128xf32>
    %c0_8 = arith.constant 0 : index
    %c0_9 = arith.constant 0 : index
    %14 = vector.load %arg5[%c0_8, %c0_9] : memref<8x128xf32, #tpu.memory_space<vmem>>, vector<8x128xf32>
    tpu.vector_store %arg5[%c0_8, %c0_9], %13 {strides = array<i32>} : memref<8x128xf32, #tpu.memory_space<vmem>>, vector<8x128xf32>,
    %c0_i32_10 = arith.constant 0 : i32
    %15 = arith.cmpi eq, %arg1, %c0_i32_10 : i32
    %16 = arith.extui %15 : i1 to i32
    %c0_i32_11 = arith.constant 0 : i32
    %17 = arith.cmpi ne, %16, %c0_i32_11 : i32
    scf.if %17 {
      %c0_12 = arith.constant 0 : index
      %c0_13 = arith.constant 0 : index
      %18 = vector.load %arg5[%c0_12, %c0_13] : memref<8x128xf32, #tpu.memory_space<vmem>>, vector<8x128xf32>
      %19 = vector.shape_cast %18 : vector<8x128xf32> to vector<1x8x128xf32>
      %cst_14 = arith.constant dense<0.000000e+00> : vector<1xf32>
      %20 = vector.multi_reduction <add>, %19, %cst_14 [1, 2] : vector<1x8x128xf32> to vector<1xf32>
      %21 = vector.shape_cast %20 : vector<1xf32> to vector<1x1x1xf32>
      %22 = vector.extract %21[0, 0, 0] : f32 from vector<1x1x1xf32>
      %cst_15 = arith.constant 9.765625E-4 : f32
      %23 = arith.mulf %22, %cst_15 : f32
      %24 = vector.broadcast %23 : f32 to vector<1x1x128xf32>
      %c0_16 = arith.constant 0 : index
      %c0_17 = arith.constant 0 : index
      %c0_18 = arith.constant 0 : index
      %25 = vector.load %arg4[%c0_16, %c0_17, %c0_18] : memref<1x1x128xf32, #tpu.memory_space<vmem>>, vector<1x1x128xf32>
      tpu.vector_store %arg4[%c0_16, %c0_17, %c0_18], %24 {strides = array<i32>} : memref<1x1x128xf32, #tpu.memory_space<vmem>>, vector<1x1x128xf32>,
    } else {
    }
    return
  }
  func.func @transform_0(%arg0: i32, %arg1: i32) -> (i32, i32) {
    %c1_i32 = arith.constant 1 : i32
    %0 = arith.muli %arg0, %c1_i32 : i32
    %1 = arith.addi %0, %arg1 : i32
    %c0_i32 = arith.constant 0 : i32
    %c0_i32_0 = arith.constant 0 : i32
    return %1, %c0_i32 : i32, i32
  }
  func.func @transform_1(%arg0: i32, %arg1: i32) -> (i32, i32) {
    %c1_i32 = arith.constant 1 : i32
    %0 = arith.muli %arg0, %c1_i32 : i32
    %1 = arith.addi %0, %arg1 : i32
    %c0_i32 = arith.constant 0 : i32
    %c0_i32_0 = arith.constant 0 : i32
    return %1, %c0_i32 : i32, i32
  }
  func.func @transform_2(%arg0: i32, %arg1: i32) -> (i32, i32, i32) {
    %c0_i32 = arith.constant 0 : i32
    %c0_i32_0 = arith.constant 0 : i32
    %c0_i32_1 = arith.constant 0 : i32
    return %arg0, %c0_i32, %c0_i32_0 : i32, i32, i32
  }
}

</mosaic_0001>

<bundles_post_ra>
// kernel: tpu_custom_call.1
= control target key start
LH: loop header
LB: loop body
LE: loop exit
PB: predicated region body
PF: predicated region fallthrough
CT: control target
= control target key end

     0   :  { %7 = vsyncpa [#allocation4], 0  ;;  %s221_s0 = inlined_call_operand.hbm [shape: f32[8,128], index: 0, kind: input, shape index: {}]   ;;  %s222_s1 = inlined_call_operand.hbm [shape: f32[8,128], index: 1, kind: input, shape index: {}]   ;;  %s223_s2 = inlined_call_operand.hbm [shape: f32[1,1,128], index: 2, kind: output, shape index: {}]  }
   0x1   :  { %8 = vsyncpa [#allocation7], 0 }
   0x2   :  { %9 = vsyncpa [#allocation5], 0  ;;  %s167_s9 = smov [#allocation3]   ;;  %s168_s11 = smov [#allocation6]  }
   0x3   :  { %s19_s10 = sshll.u32 %s167_s9, 4  ;;  %s32_s12 = sshll.u32 %s168_s11, 4  ;;  %s20_s10 = int_to_ptr.vmem [resolvable:$true] %s19_s10  ;;  %s33_s12 = int_to_ptr.vmem [resolvable:$true] %s32_s12 }
   0x4   :  { %s95_s15 = scalar_lea.hbm %s221_s0, 128 }
   0x5   :  { %p96_p0 = scmp.ne.s32.totalorder %s221_s0, %s95_s15  ;;  %p99_p1 = scmp.lt.u32.totalorder %s95_s15, %s221_s0 }
   0x7   :  { %p101_p2 = pnand %p99_p1, %p96_p0 }
   0x9   :  { %104 = shalt.err (!%p101_p2)
}
   0xa   :  { %s105_s20 = scalar_lea.vmem %s20_s10, 128  ;;  %p110_p4 = scmp.lt.s32.totalorder %s20_s10, %s20_s10 }
   0xb   :  { %p106_p3 = scmp.ne.s32.totalorder %s20_s10, %s105_s20  ;;  %p111_p5 = scmp.lt.s32.totalorder %s105_s20, %s105_s20 }
   0xd   :  { %p112_p6 = por %p111_p5, %p110_p4 }
   0xf   :  { %p113_p7 = pnand %p112_p6, %p106_p3 }
  0x11   :  { %116 = shalt.err (!%p113_p7)
}
  0x12   :  { %22 = dma.hbm_to_vmem [thread:$0]  %s221_s0, 128, %s20_s10, [#allocation4]  }
  0x13   :  { %s117_s25 = scalar_lea.hbm %s222_s1, 128 }
  0x14   :  { %p118_p8 = scmp.ne.s32.totalorder %s222_s1, %s117_s25  ;;  %p121_p9 = scmp.lt.u32.totalorder %s117_s25, %s222_s1 }
  0x16   :  { %p123_p10 = pnand %p121_p9, %p118_p8 }
  0x18   :  { %126 = shalt.err (!%p123_p10)
}
  0x19   :  { %s127_s30 = scalar_lea.vmem %s33_s12, 128  ;;  %p132_p12 = scmp.lt.s32.totalorder %s33_s12, %s33_s12 }
  0x1a   :  { %p128_p11 = scmp.ne.s32.totalorder %s33_s12, %s127_s30  ;;  %p133_p13 = scmp.lt.s32.totalorder %s127_s30, %s127_s30 }
  0x1c   :  { %p134_p0 = por %p133_p13, %p132_p12 }
  0x1e   :  { %p135_p1 = pnand %p134_p0, %p128_p11 }
  0x20   :  { %138 = shalt.err (!%p135_p1)
}
  0x21   :  { %35 = dma.hbm_to_vmem [thread:$0]  %s222_s1, 128, %s33_s12, [#allocation7]  }
  0x22   :  { %161 = dma.done.wait [#allocation4], 128  }
  0x23   :  { %162 = vsyncadd [#allocation4], 4294967168 }
  0x24   :  { %163 = dma.done.wait [#allocation7], 128  }
  0x25   :  { %164 = vsyncadd [#allocation7], 4294967168  ;;  %v49_v0 = vld [vmem:[#allocation3] sm:$0xff]  ;;  %v50_v1 = vld [vmem:[#allocation6] sm:$0xff]  ;;  %s169_s4 = smov [#allocation8]  }
  0x26   :  { %v51_v2 = vmul.f32 %v50_v1, %v49_v0  ;;  %s80_s1 = sshll.u32 %s169_s4, 4  ;;  %s81_s1 = int_to_ptr.vmem [resolvable:$true] %s80_s1 }
  0x27   :  { %s139_s7 = scalar_lea.vmem %s81_s1, 16  ;;  %s143_s8 = scalar_lea.vmem %s81_s1, 32 }
  0x28   :  { %v52_v3 = vsub.f32 1.0, %v51_v2  ;;  %p140_p2 = scmp.ne.s32.totalorder %s81_s1, %s139_s7  ;;  %p144_p3 = scmp.lt.s32.totalorder %s81_s1, %s81_s1 }
  0x29   :  { %p145_p4 = scmp.lt.s32.totalorder %s143_s8, %s139_s7 }
  0x2a   :  { %v53_v4 = vmax.f32 %v52_v3, 0.0 }
  0x2b   :  { %p146_p5 = por %p145_p4, %p144_p3 }
  0x2c   :  { %62 = vadd.xlane.f32.xlu0 %v53_v4 }
  0x2d   :  { %p147_p6 = pnand %p146_p5, %p140_p2 }
  0xb9   :  { %v63_v5 = vpop.xlane.xlu0 %62 }
  0xba   :  { %v64_v6 = vrot.slane %v63_v5, 4 }
  0xbc   :  { %v65_v7 = vadd.f32 %v64_v6, %v63_v5 }
  0xbe   :  { %v66_v8 = vrot.slane %v65_v7, 2 }
  0xc0   :  { %v67_v9 = vadd.f32 %v66_v8, %v65_v7 }
  0xc2   :  { %v68_v10 = vrot.slane %v67_v9, 1 }
  0xc4   :  { %v69_v11 = vadd.f32 %v68_v10, %v67_v9 }
  0xc6   :  { %90 = vpush %v69_v11 }
  0xf7   :  { %s91_s5 = spop %90 }
  0xf8   :  { %s71_s6 = smul.f32 0.0009765625, %s91_s5 }
  0xfa   :  { %v72_v12 = vstv %s71_s6 }
  0xfb   :  { %73 = vst [vmem:[#allocation8] sm:$0x1] %v72_v12 }
  0xfc   :  { %150 = shalt.err (!%p147_p6)
}
  0xfd   :  { %s151_s11 = scalar_lea.hbm %s223_s2, 16 }
  0xfe   :  { %p152_p7 = scmp.ne.s32.totalorder %s223_s2, %s151_s11  ;;  %p155_p8 = scmp.lt.u32.totalorder %s151_s11, %s223_s2 }
 0x100   :  { %p157_p9 = pnand %p155_p8, %p152_p7 }
 0x102   :  { %160 = shalt.err (!%p157_p9)
}
 0x103   :  { %83 = dma.vmem_to_hbm [thread:$0]  %s81_s1, 16, %s223_s2, [#allocation5]  }
 0x104   :  { %165 = dma.done.wait [#allocation5], 16  }
 0x105   :  { %166 = vsyncadd [#allocation5], 4294967280 }
 0x106   :  { %87 = vsyncpa [#allocation4], 1 }
 0x107   :  { %88 = vsyncpa [#allocation7], 1 }
 0x108   :  { %89 = vsyncpa [#allocation5], 1 }

</bundles_post_ra>
